<compile_context>
chip_gen: v7x
topology: tpu7x:2x2x1
jax: 0.10.0
libtpu: 0.0.40
codegen_flags: <defaults>
</compile_context>

<pallas_src>
import jax
import jax.numpy as jnp
from jax.experimental import pallas as pl
from jax.experimental.pallas import tpu as pltpu


def _sigmoid_kernel_d0(x_ref, o_ref):
    # Compute in f32 (keeps the EUP exp on its fast path even for bf16 inputs, esp. v5e).
    x = x_ref[...].astype(jnp.float32)
    o_ref[...] = jax.nn.sigmoid(x).astype(o_ref.dtype)


def _sigmoid_kernel_d1(x_ref, o_ref):
    x = x_ref[...].astype(jnp.float32)
    s = jax.nn.sigmoid(x)
    o_ref[...] = (s * (1.0 - s)).astype(o_ref.dtype)


def _sigmoid_kernel_d2(x_ref, o_ref):
    x = x_ref[...].astype(jnp.float32)
    s = jax.nn.sigmoid(x)
    o_ref[...] = (s * (1.0 - s) * (1.0 - 2.0 * s)).astype(o_ref.dtype)


_KERNELS = {0: _sigmoid_kernel_d0, 1: _sigmoid_kernel_d1, 2: _sigmoid_kernel_d2}

_LANES = 128
_SUBLANES = 8
_MAX_TILE_ROWS = 4096     # 4096*128*4B = 2 MiB per f32 buffer (mem-bound sweet spot)
_MIN_SPLIT_ROWS = 2048    # only force a >=2-way grid split when each half is >=1 MiB


def sigmoid_pallas(x, derivative: int = 0):
    """Forward pass of strupnet Sigmoid: s, s*(1-s) or s*(1-s)*(1-2s) with s=sigmoid(x)."""
    if derivative not in (0, 1, 2):
        raise ValueError("derivative must be 0, 1 or 2")

    orig_shape = x.shape
    orig_dtype = x.dtype
    n = x.size

    # Pad the flattened array only up to a multiple of one (8,128) vreg tile (1024 elems),
    # NOT a full grid block — keeps wrapper-side HBM traffic negligible.
    pad_unit = _SUBLANES * _LANES
    n_pad = pl.cdiv(max(n, 1), pad_unit) * pad_unit
    x_flat = jnp.ravel(x)
    if n_pad != n:
        x_flat = jnp.pad(x_flat, (0, n_pad - n))
    rows = n_pad // _LANES
    x2d = x_flat.reshape(rows, _LANES)

    # Pick the largest block that fits comfortably in scoped VMEM on all generations.
    tile_rows = min(_MAX_TILE_ROWS, rows)
    num_blocks = pl.cdiv(rows, tile_rows)
    # v7x has 2 TensorCores: make sure a medium-sized input still yields >=2 grid steps.
    if num_blocks == 1 and rows >= 2 * _MIN_SPLIT_ROWS:
        tile_rows = pl.cdiv(pl.cdiv(rows, 2), 32) * 32
        num_blocks = pl.cdiv(rows, tile_rows)
    grid = (num_blocks,)

    # VMEM budget: in + out, double-buffered (4x block) plus headroom; stays under
    # the 16 MiB v5e default and well under v7x's 64 MiB physical VMEM.
    block_bytes = tile_rows * _LANES * jnp.dtype(orig_dtype).itemsize
    vmem_limit = int(min(max(6 * block_bytes, 8 * 1024 * 1024), 48 * 1024 * 1024))

    out2d = pl.pallas_call(
        _KERNELS[derivative],
        out_shape=jax.ShapeDtypeStruct((rows, _LANES), orig_dtype),
        grid_spec=pltpu.PrefetchScalarGridSpec(
            num_scalar_prefetch=0,
            grid=grid,
            in_specs=[pl.BlockSpec((tile_rows, _LANES), lambda i: (i, 0))],
            out_specs=pl.BlockSpec((tile_rows, _LANES), lambda i: (i, 0)),
        ),
        compiler_params=pltpu.CompilerParams(
            dimension_semantics=("parallel",),
            vmem_limit_bytes=vmem_limit,
        ),
    )(x2d)

    out_flat = out2d.reshape(-1)
    if n_pad != n:
        out_flat = out_flat[:n]
    return out_flat.reshape(orig_shape)


if __name__ == "__main__":
    key = jax.random.PRNGKey(0)
    x = jax.random.normal(key, (2, 4, 16, 16), dtype=jnp.float32)

    ok = True
    for d in (0, 1, 2):
        out = jax.block_until_ready(sigmoid_pallas(x, derivative=d))
        s = jax.nn.sigmoid(x)
        if d == 0:
            ref = s
        elif d == 1:
            ref = s * (1.0 - s)
        else:
            ref = s * (1.0 - s) * (1.0 - 2.0 * s)
        if out.shape != x.shape or not jnp.allclose(out, ref, atol=1e-5, rtol=1e-5):
            ok = False

    if ok:
        print("KERNEL_OK")
</pallas_src>

<mosaic_0001>
module attributes {stable_mosaic.version = 11 : i64} {
  func.func @_sigmoid_kernel_d0(%arg0: i32, %arg1: memref<16x128xf32, #tpu.memory_space<vmem>>, %arg2: memref<16x128xf32, #tpu.memory_space<vmem>>) attributes {dimension_semantics = [#tpu.dimension_semantics<parallel>], iteration_bounds = array<i64: 1>, scalar_prefetch = 0 : i64, scratch_operands = 0 : i64, tpu.core_type = #tpu.core_type<tc>, window_params = [{transform_indices = @transform_0, window_bounds = array<i64: 16, 128>}, {transform_indices = @transform_1, window_bounds = array<i64: 16, 128>}]} {
    %c0 = arith.constant 0 : index
    %c0_0 = arith.constant 0 : index
    %0 = vector.load %arg1[%c0, %c0_0] : memref<16x128xf32, #tpu.memory_space<vmem>>, vector<16x128xf32>
    %1 = arith.negf %0 : vector<16x128xf32>
    %2 = math.exp %1 : vector<16x128xf32>
    %cst = arith.constant 1.000000e+00 : f32
    %3 = vector.broadcast %cst : f32 to vector<16x128xf32>
    %4 = arith.addf %3, %2 : vector<16x128xf32>
    %5 = arith.divf %3, %4 : vector<16x128xf32>
    %c0_1 = arith.constant 0 : index
    %c0_2 = arith.constant 0 : index
    %6 = vector.load %arg2[%c0_1, %c0_2] : memref<16x128xf32, #tpu.memory_space<vmem>>, vector<16x128xf32>
    tpu.vector_store %arg2[%c0_1, %c0_2], %5 {strides = array<i32>} : memref<16x128xf32, #tpu.memory_space<vmem>>, vector<16x128xf32>,
    return
  }
  func.func @transform_0(%arg0: i32) -> (i32, i32) {
    %c0_i32 = arith.constant 0 : i32
    %c0_i32_0 = arith.constant 0 : i32
    return %arg0, %c0_i32 : i32, i32
  }
  func.func @transform_1(%arg0: i32) -> (i32, i32) {
    %c0_i32 = arith.constant 0 : i32
    %c0_i32_0 = arith.constant 0 : i32
    return %arg0, %c0_i32 : i32, i32
  }
}

</mosaic_0001>

<bundles_post_ra>
// kernel: tpu_custom_call.1
= control target key start
LH: loop header
LB: loop body
LE: loop exit
PB: predicated region body
PF: predicated region fallthrough
CT: control target
= control target key end

     0   :  { %6 = vsyncpa [#allocation3], 0  ;;  %s162_s0 = inlined_call_operand.hbm [shape: f32[16,128], index: 0, kind: input, shape index: {}]   ;;  %s163_s1 = inlined_call_operand.hbm [shape: f32[16,128], index: 1, kind: output, shape index: {}]  }
   0x1   :  { %7 = vsyncpa [#allocation4], 0  ;;  %s118_s6 = smov [#allocation2]   ;;  %s70_s10 = scalar_lea.hbm %s162_s0, 256 }
   0x2   :  { %s13_s7 = sshll.u32 %s118_s6, 4  ;;  %p71_p0 = scmp.ne.s32.totalorder %s162_s0, %s70_s10  ;;  %s14_s7 = int_to_ptr.vmem [resolvable:$true] %s13_s7 }
   0x3   :  { %p74_p1 = scmp.lt.u32.totalorder %s70_s10, %s162_s0 }
   0x5   :  { %p76_p2 = pnand %p74_p1, %p71_p0 }
   0x7   :  { %79 = shalt.err (!%p76_p2)
}
   0x8   :  { %s80_s15 = scalar_lea.vmem %s14_s7, 256  ;;  %p85_p4 = scmp.lt.s32.totalorder %s14_s7, %s14_s7 }
   0x9   :  { %p81_p3 = scmp.ne.s32.totalorder %s14_s7, %s80_s15  ;;  %p86_p5 = scmp.lt.s32.totalorder %s80_s15, %s80_s15 }
   0xb   :  { %p87_p6 = por %p86_p5, %p85_p4 }
   0xd   :  { %p88_p7 = pnand %p87_p6, %p81_p3 }
   0xf   :  { %91 = shalt.err (!%p88_p7)
}
  0x10   :  { %s119_s16 = smov 128   ;;  %s120_s17 = smov 8  }
  0x11   :  { %19 = dma.hbm_to_vmem [thread:$0]  %s162_s0, 256, %s14_s7, [#allocation3], %s119_s16, %s119_s16, %s120_s17  }
  0x12   :  { %114 = dma.done.wait [#allocation3], 256  }
  0x13   :  { %115 = vsyncadd [#allocation3], 4294967040  ;;  %v23_v0 = vld [vmem:[#allocation2] sm:$0xff]  ;;  %v24_v1 = vld [vmem:[#allocation2 + $0x8] sm:$0xff]  ;;  %s121_s20 = smov [#allocation5]  }
  0x14   :  { %v56_v2 = vmul.f32 -1.442695, %v23_v0  ;;  %v57_v3 = vmul.f32 -1.442695, %v24_v1  ;;  %s44_s21 = sshll.u32 %s121_s20, 4  ;;  %s45_s21 = int_to_ptr.vmem [resolvable:$true] %s44_s21 }
  0x15   :  { %s92_s0 = scalar_lea.vmem %s45_s21, 256  ;;  %p97_p9 = scmp.lt.s32.totalorder %s45_s21, %s45_s21 }
  0x16   :  { %62 = vpow2.f32 %v56_v2  ;;  %p93_p8 = scmp.ne.s32.totalorder %s45_s21, %s92_s0  ;;  %p98_p10 = scmp.lt.s32.totalorder %s92_s0, %s92_s0 }
  0x17   :  { %64 = vpow2.f32 %v57_v3 }
  0x18   :  { %p99_p11 = por %p98_p10, %p97_p9 }
  0x1a   :  { %p100_p12 = pnand %p99_p11, %p93_p8 }
  0x20   :  { %v63_v4 = vpop.eup %62 }
  0x21   :  { %v65_v5 = vpop.eup %64  ;;  %v31_v6 = vadd.f32 1.0, %v63_v4 }
  0x22   :  { %v32_v7 = vadd.f32 1.0, %v65_v5 }
  0x23   :  { %66 = vrcp.f32 %v31_v6 }
  0x24   :  { %68 = vrcp.f32 %v32_v7 }
  0x2d   :  { %v67_v8 = vpop.eup %66 }
  0x2e   :  { %v69_v9 = vpop.eup %68  ;;  %37 = vst [vmem:[#allocation5] sm:$0xff] %v67_v8 }
  0x2f   :  { %38 = vst [vmem:[#allocation5 + $0x8] sm:$0xff] %v69_v9 }
  0x30   :  { %103 = shalt.err (!%p100_p12)
}
  0x31   :  { %s104_s24 = scalar_lea.hbm %s163_s1, 256 }
  0x32   :  { %p105_p13 = scmp.ne.s32.totalorder %s163_s1, %s104_s24  ;;  %p108_p0 = scmp.lt.u32.totalorder %s104_s24, %s163_s1 }
  0x34   :  { %p110_p1 = pnand %p108_p0, %p105_p13 }
  0x36   :  { %113 = shalt.err (!%p110_p1)
}
  0x37   :  { %50 = dma.vmem_to_hbm [thread:$0]  %s45_s21, 256, %s163_s1, [#allocation4], %s119_s16, %s119_s16, %s120_s17  }
  0x38   :  { %116 = dma.done.wait [#allocation4], 256  }
  0x39   :  { %117 = vsyncadd [#allocation4], 4294967040 }
  0x3a   :  { %54 = vsyncpa [#allocation3], 1 }
  0x3b   :  { %55 = vsyncpa [#allocation4], 1 }

</bundles_post_ra>
